<compile_context>
chip_gen: v7x
topology: tpu7x:2x2x1
jax: 0.10.0
libtpu: 0.0.40
codegen_flags: <defaults>
</compile_context>

<pallas_src>
import math

import jax
import jax.numpy as jnp
from jax.experimental import pallas as pl
from jax.experimental.pallas import tpu as pltpu

EPS = 1e-8


def _round_up(x, m):
    return (x + m - 1) // m * m


def _nonlinearity(y, kind):
    if kind == "none":
        return y
    if kind == "relu":
        return jnp.maximum(y, 0.0)
    if kind == "leaky_relu":
        return jnp.where(y >= 0, y, 0.2 * y)
    if kind == "tanh":
        return jnp.tanh(y)
    if kind == "sigmoid":
        return jax.nn.sigmoid(y)
    if kind == "silu":
        return y * jax.nn.sigmoid(y)
    raise ValueError(f"unsupported nonlinearity: {kind}")


# ----------------------------------------------------------------------------
# Kernels
# ----------------------------------------------------------------------------
def _make_shared_style_kernel(nonlinearities, dout_pads, compute_dtype):
    """All layers share one style tensor: ONE style matmul up front, then one
    matmul per layer (slices of the pre-computed style contribution)."""
    n_layers = len(nonlinearities)

    def kernel(x_ref, s_ref, wcomb_all_ref, *rest):
        # rest = [wlin_0, b_0, wlin_1, b_1, ..., out]
        o_ref = rest[-1]
        h = x_ref[...].astype(jnp.float32)
        # One MXU push for every layer's style contribution (lane-concatenated).
        style_all = jnp.dot(s_ref[...], wcomb_all_ref[...],
                            preferred_element_type=jnp.float32)
        off = 0
        for l in range(n_layers):
            wlin_ref = rest[2 * l]
            b_ref = rest[2 * l + 1]
            d = dout_pads[l]
            y = jnp.dot(h.astype(compute_dtype), wlin_ref[...],
                        preferred_element_type=jnp.float32)
            y = y + style_all[:, off:off + d] + b_ref[...]
            h = _nonlinearity(y, nonlinearities[l])
            off += d
        o_ref[...] = h.astype(o_ref.dtype)

    return kernel


def _make_per_layer_style_kernel(nonlinearities, compute_dtype):
    """Distinct style per layer: concat [h, s] / [WlinT; Wcomb] -> one matmul
    per layer (both feature dims are 128-padded, so the concat is free)."""
    n_layers = len(nonlinearities)

    def kernel(x_ref, *rest):
        # rest = [(s_l, wstack_l, b_l) * n_layers, out]
        o_ref = rest[-1]
        h = x_ref[...].astype(jnp.float32)
        for l in range(n_layers):
            s_ref, wstack_ref, b_ref = rest[3 * l: 3 * l + 3]
            hs = jnp.concatenate([h.astype(compute_dtype), s_ref[...]], axis=-1)
            y = jnp.dot(hs, wstack_ref[...],
                        preferred_element_type=jnp.float32) + b_ref[...]
            h = _nonlinearity(y, nonlinearities[l])
        o_ref[...] = h.astype(o_ref.dtype)

    return kernel


# ----------------------------------------------------------------------------
# Parameter construction (deterministic, mirrors module __init__ shapes)
# ----------------------------------------------------------------------------
def orthogonal_init(key, out_f, in_f, gain=1.0):
    """Deterministic analogue of nn.init.orthogonal_."""
    a = jax.random.normal(key, (out_f, in_f), dtype=jnp.float32)
    transposed = out_f < in_f
    m = a.T if transposed else a
    q, r = jnp.linalg.qr(m)
    q = q * jnp.sign(jnp.diag(r))
    if transposed:
        q = q.T
    return gain * q


def build_params(key, in_features, layer_configs):
    params = []
    dh = in_features
    for cfg in layer_configs:
        dout = cfg["out_features"]
        k = cfg["style_features"]
        key, k1, k2 = jax.random.split(key, 3)
        params.append({
            # Subspace(in=style_features, out=dh): weight (dh, k), orthogonal init
            "subspace_weight": orthogonal_init(k1, dh, k, gain=1.0),
            # ShiftedLinearLayer: weight (dout, dh)
            "linear_weight": jax.random.normal(k2, (dout, dh), jnp.float32),
            "input_bias": jnp.full((dh,), cfg.get("input_bias_init_val", 0.0),
                                   jnp.float32),
            "bias": jnp.full((dout,), cfg.get("bias_init_val", 0.0), jnp.float32),
        })
        dh = dout
    return params


def _effective_weights(p, cfg, din):
    """Plain-JAX parameter prep (Subspace._get_weight / demodulation)."""
    k = cfg["style_features"]
    lr_mult = cfg.get("lr_multiplier", 1.0)

    # Subspace effective weight (normalize_basis=True default, no orthogonalize)
    w_sub = p["subspace_weight"] * (1.0 / math.sqrt(k))
    if cfg.get("normalize_basis", True):
        demod = jax.lax.rsqrt(jnp.sum(w_sub * w_sub, axis=0, keepdims=True) + EPS)
        w_sub = w_sub * demod

    # ShiftedLinearLayer effective weight (equalized lr + row demodulation)
    w_lin = p["linear_weight"] * (lr_mult / math.sqrt(din))
    if cfg.get("demodulate", True):
        demod = jax.lax.rsqrt(jnp.sum(w_lin * w_lin, axis=1, keepdims=True) + EPS)
        w_lin = w_lin * demod

    bias = p["bias"] * lr_mult
    return w_sub, w_lin, p["input_bias"], bias


# ----------------------------------------------------------------------------
# Full forward: one fused pallas_call for the whole stack
# ----------------------------------------------------------------------------
def stacked_modulated_subspace_forward(params, layer_configs, x, styles, *,
                                       compute_dtype=jnp.float32,
                                       max_batch_tile=512,
                                       min_grid_steps=2):
    n_layers = len(layer_configs)
    shared_style = not isinstance(styles, (list, tuple))
    styles_list = [styles] * n_layers if shared_style else list(styles)
    assert len(styles_list) == n_layers

    B, din0 = x.shape
    nonlins = tuple(cfg.get("nonlinearity", "relu") for cfg in layer_configs)

    # ---- effective weights + algebraic fold (plain JAX, one time) ----
    folded = []
    din = din0
    for cfg, p in zip(layer_configs, params):
        w_sub, w_lin, ib, b = _effective_weights(p, cfg, din)
        wlin_t = w_lin.T                      # (din, dout)   pre-transposed
        wcomb = w_sub.T @ wlin_t              # (k,   dout)   folded W V
        fib = cfg.get("fixed_input_bias")
        ib_total = ib if fib is None else ib + float(fib)
        b_eff = ib_total @ wlin_t + b         # (dout,)
        fb = cfg.get("fixed_bias")
        if fb is not None:
            b_eff = b_eff + float(fb)
        folded.append((wlin_t, wcomb, b_eff))
        din = w_lin.shape[0]
    dout_final = din

    # ---- pad every feature dim to a multiple of 128 (full-lane vregs/MXU tiles)
    din0_pad = _round_up(din0, 128)
    padded, dout_pads, k_pads = [], [], []
    prev_pad = din0_pad
    for wlin_t, wcomb, b_eff in folded:
        din_l, dout_l = wlin_t.shape
        k_l = wcomb.shape[0]
        dout_pad = _round_up(dout_l, 128)
        k_pad = _round_up(k_l, 128)
        wlin_p = jnp.pad(wlin_t, ((0, prev_pad - din_l), (0, dout_pad - dout_l)))
        wcomb_p = jnp.pad(wcomb, ((0, k_pad - k_l), (0, dout_pad - dout_l)))
        b_p = jnp.pad(b_eff, (0, dout_pad - dout_l)).reshape(1, dout_pad)
        padded.append((wlin_p, wcomb_p, b_p))
        dout_pads.append(dout_pad)
        k_pads.append(k_pad)
        prev_pad = dout_pad
    dout_final_pad = dout_pads[-1]

    # ---- batch tiling: >= min_grid_steps parallel blocks (v7x: 2 TCs) ----
    tb = min(_round_up(pl.cdiv(B, max(min_grid_steps, 1)), 8), max_batch_tile)
    b_pad = _round_up(B, tb)
    grid_b = b_pad // tb
    x_pad = jnp.pad(x, ((0, b_pad - B), (0, din0_pad - din0)))

    dsize = jnp.dtype(compute_dtype).itemsize
    vmem_need = 2 * tb * dout_final_pad * 4        # double-buffered output tile

    # ---- assemble inputs / BlockSpecs ----
    if shared_style:
        s = styles_list[0]
        k = s.shape[-1]
        k_pad = k_pads[0]
        assert all(kp == k_pad for kp in k_pads)
        s_pad = jnp.pad(s, ((0, b_pad - B), (0, k_pad - k))).astype(compute_dtype)
        wcomb_all = jnp.concatenate([wc for (_, wc, _) in padded],
                                    axis=1).astype(compute_dtype)
        inputs = [x_pad, s_pad, wcomb_all]
        in_specs = [
            pl.BlockSpec((tb, din0_pad), lambda i: (i, 0)),
            pl.BlockSpec((tb, k_pad), lambda i: (i, 0)),
            pl.BlockSpec(wcomb_all.shape, lambda i: (0, 0),
                         pipeline_mode=pl.Buffered(1)),
        ]
        vmem_need += 2 * tb * din0_pad * 4 + 2 * tb * k_pad * dsize
        vmem_need += int(wcomb_all.size) * dsize
        for wlin_p, _, b_p in padded:
            wl = wlin_p.astype(compute_dtype)
            inputs += [wl, b_p]
            in_specs += [
                pl.BlockSpec(wl.shape, lambda i: (0, 0),
                             pipeline_mode=pl.Buffered(1)),
                pl.BlockSpec(b_p.shape, lambda i: (0, 0),
                             pipeline_mode=pl.Buffered(1)),
            ]
            vmem_need += int(wl.size) * dsize + int(b_p.size) * 4
        kernel = _make_shared_style_kernel(nonlins, tuple(dout_pads), compute_dtype)
    else:
        inputs = [x_pad]
        in_specs = [pl.BlockSpec((tb, din0_pad), lambda i: (i, 0))]
        vmem_need += 2 * tb * din0_pad * 4
        for (wlin_p, wcomb_p, b_p), s, k_pad in zip(padded, styles_list, k_pads):
            k = s.shape[-1]
            s_pad = jnp.pad(s, ((0, b_pad - B), (0, k_pad - k))).astype(compute_dtype)
            wstack = jnp.concatenate([wlin_p, wcomb_p],
                                     axis=0).astype(compute_dtype)
            inputs += [s_pad, wstack, b_p]
            in_specs += [
                pl.BlockSpec((tb, k_pad), lambda i: (i, 0)),
                pl.BlockSpec(wstack.shape, lambda i: (0, 0),
                             pipeline_mode=pl.Buffered(1)),
                pl.BlockSpec(b_p.shape, lambda i: (0, 0),
                             pipeline_mode=pl.Buffered(1)),
            ]
            vmem_need += 2 * tb * k_pad * dsize + int(wstack.size) * dsize \
                + int(b_p.size) * 4
            kernel = _make_per_layer_style_kernel(nonlins, compute_dtype)

    # ---- cost estimate (helps XLA schedule around the custom call) ----
    flops = 0
    for wlin_p, wcomb_p, _ in padded:
        flops += 2 * b_pad * wlin_p.shape[0] * wlin_p.shape[1]
        flops += 2 * b_pad * wcomb_p.shape[0] * wcomb_p.shape[1]
    transc = sum(b_pad * dp for nl, dp in zip(nonlins, dout_pads)
                 if nl in ("tanh", "sigmoid", "silu"))
    bytes_acc = sum(int(a.size) * a.dtype.itemsize for a in inputs) \
        + b_pad * dout_final_pad * 4

    # ---- VMEM budget: streamed tiles double-buffered, constants single ----
    vmem_limit = int(min(max(vmem_need + (8 << 20), 32 << 20), 64 << 20))

    out = pl.pallas_call(
        kernel,
        out_shape=jax.ShapeDtypeStruct((b_pad, dout_final_pad), x.dtype),
        grid=(grid_b,),
        in_specs=in_specs,
        out_specs=pl.BlockSpec((tb, dout_final_pad), lambda i: (i, 0)),
        compiler_params=pltpu.CompilerParams(
            dimension_semantics=("parallel",),
            vmem_limit_bytes=vmem_limit),
        cost_estimate=pl.CostEstimate(flops=int(flops),
                                      transcendentals=int(transc),
                                      bytes_accessed=int(bytes_acc)),
    )(*inputs)
    return out[:B, :dout_final]


# ----------------------------------------------------------------------------
# Plain-JAX reference (un-folded math, mirrors the torch module) for checking
# ----------------------------------------------------------------------------
def reference_forward(params, layer_configs, x, styles):
    if not isinstance(styles, (list, tuple)):
        styles = [styles] * len(layer_configs)
    for cfg, p, s in zip(layer_configs, params, styles):
        din = x.shape[-1]
        w_sub, w_lin, ib, b = _effective_weights(p, cfg, din)
        dx = s @ w_sub.T + ib
        if cfg.get("fixed_input_bias") is not None:
            dx = dx + cfg["fixed_input_bias"]
        y = (x + dx) @ w_lin.T + b
        if cfg.get("fixed_bias") is not None:
            y = y + cfg["fixed_bias"]
        x = _nonlinearity(y, cfg.get("nonlinearity", "relu"))
    return x


# ----------------------------------------------------------------------------
if __name__ == "__main__":
    B = 16
    IN_FEATURES = 32
    STYLE_FEATURES = 16
    layer_configs = [
        {"out_features": 64, "style_features": STYLE_FEATURES,
         "nonlinearity": "relu", "fixed_input_bias": 0.1,
         "lr_multiplier": 1.5},
        {"out_features": 48, "style_features": STYLE_FEATURES,
         "nonlinearity": "silu", "fixed_bias": -0.05,
         "bias_init_val": 0.3, "input_bias_init_val": -0.2},
        {"out_features": 24, "style_features": STYLE_FEATURES,
         "nonlinearity": "tanh"},
    ]
    OUT_FEATURES = layer_configs[-1]["out_features"]

    key = jax.random.PRNGKey(0)
    kx, ks, kp, ks2 = jax.random.split(key, 4)
    x = jax.random.normal(kx, (B, IN_FEATURES), jnp.float32)
    style = jax.random.normal(ks, (B, STYLE_FEATURES), jnp.float32)
    params = build_params(kp, IN_FEATURES, layer_configs)

    # 1) shared style, f32 MXU operands — strict check
    out = jax.block_until_ready(
        stacked_modulated_subspace_forward(params, layer_configs, x, style))
    assert out.shape == (B, OUT_FEATURES), out.shape
    ref = reference_forward(params, layer_configs, x, style)
    err = float(jnp.max(jnp.abs(out - ref)))
    assert err < 3e-5, err

    # 2) shared style, bf16 MXU operands (f32 accumulation/epilogue) — loose check
    out_bf16 = jax.block_until_ready(
        stacked_modulated_subspace_forward(params, layer_configs, x, style,
                                           compute_dtype=jnp.bfloat16))
    err_bf16 = float(jnp.max(jnp.abs(out_bf16 - ref)))
    assert err_bf16 < 1e-1, err_bf16

    # 3) distinct per-layer styles (general path: one fused matmul per layer)
    styles_list = list(jax.random.normal(
        ks2, (len(layer_configs), B, STYLE_FEATURES), jnp.float32))
    out_list = jax.block_until_ready(
        stacked_modulated_subspace_forward(params, layer_configs, x, styles_list))
    ref_list = reference_forward(params, layer_configs, x, styles_list)
    err_list = float(jnp.max(jnp.abs(out_list - ref_list)))
    assert err_list < 3e-5, err_list

    print("KERNEL_OK")
</pallas_src>

<mosaic_0001>
module attributes {stable_mosaic.version = 11 : i64} {
  func.func @kernel(%arg0: i32, %arg1: memref<8x128xf32, #tpu.memory_space<vmem>>, %arg2: memref<8x128xf32, #tpu.memory_space<vmem>>, %arg3: memref<128x384xf32, #tpu.memory_space<vmem>>, %arg4: memref<128x128xf32, #tpu.memory_space<vmem>>, %arg5: memref<1x128xf32, #tpu.memory_space<vmem>>, %arg6: memref<128x128xf32, #tpu.memory_space<vmem>>, %arg7: memref<1x128xf32, #tpu.memory_space<vmem>>, %arg8: memref<128x128xf32, #tpu.memory_space<vmem>>, %arg9: memref<1x128xf32, #tpu.memory_space<vmem>>, %arg10: memref<8x128xf32, #tpu.memory_space<vmem>>) attributes {dimension_semantics = [#tpu.dimension_semantics<parallel>], iteration_bounds = array<i64: 2>, scalar_prefetch = 0 : i64, scratch_operands = 0 : i64, tpu.core_type = #tpu.core_type<tc>, window_params = [{transform_indices = @transform_0, window_bounds = array<i64: 8, 128>}, {transform_indices = @transform_1, window_bounds = array<i64: 8, 128>}, {pipeline_mode = #tpu.pipeline_mode<synchronous>, transform_indices = @transform_2, window_bounds = array<i64: 128, 384>}, {pipeline_mode = #tpu.pipeline_mode<synchronous>, transform_indices = @transform_3, window_bounds = array<i64: 128, 128>}, {pipeline_mode = #tpu.pipeline_mode<synchronous>, transform_indices = @transform_4, window_bounds = array<i64: 1, 128>}, {pipeline_mode = #tpu.pipeline_mode<synchronous>, transform_indices = @transform_5, window_bounds = array<i64: 128, 128>}, {pipeline_mode = #tpu.pipeline_mode<synchronous>, transform_indices = @transform_6, window_bounds = array<i64: 1, 128>}, {pipeline_mode = #tpu.pipeline_mode<synchronous>, transform_indices = @transform_7, window_bounds = array<i64: 128, 128>}, {pipeline_mode = #tpu.pipeline_mode<synchronous>, transform_indices = @transform_8, window_bounds = array<i64: 1, 128>}, {transform_indices = @transform_9, window_bounds = array<i64: 8, 128>}]} {
    %c0 = arith.constant 0 : index
    %c0_0 = arith.constant 0 : index
    %0 = vector.load %arg1[%c0, %c0_0] : memref<8x128xf32, #tpu.memory_space<vmem>>, vector<8x128xf32>
    %c0_1 = arith.constant 0 : index
    %c0_2 = arith.constant 0 : index
    %1 = vector.load %arg2[%c0_1, %c0_2] : memref<8x128xf32, #tpu.memory_space<vmem>>, vector<8x128xf32>
    %c0_3 = arith.constant 0 : index
    %c0_4 = arith.constant 0 : index
    %2 = vector.load %arg3[%c0_3, %c0_4] : memref<128x384xf32, #tpu.memory_space<vmem>>, vector<128x384xf32>
    %cst = arith.constant dense<0.000000e+00> : vector<8x384xf32>
    %3 = tpu.matmul %1, %2, %cst {dimension_numbers = #tpu.dot_dimension_numbers<[1], [0], [0], [1], [0, 0, 1, 1], [], []>} : vector<8x128xf32>, vector<128x384xf32>, vector<8x384xf32> -> vector<8x384xf32>
    %c0_5 = arith.constant 0 : index
    %c0_6 = arith.constant 0 : index
    %4 = vector.load %arg4[%c0_5, %c0_6] : memref<128x128xf32, #tpu.memory_space<vmem>>, vector<128x128xf32>
    %cst_7 = arith.constant dense<0.000000e+00> : vector<8x128xf32>
    %5 = tpu.matmul %0, %4, %cst_7 {dimension_numbers = #tpu.dot_dimension_numbers<[1], [0], [0], [1], [0, 0, 1, 1], [], []>} : vector<8x128xf32>, vector<128x128xf32>, vector<8x128xf32> -> vector<8x128xf32>
    %6 = vector.extract_strided_slice %3 {offsets = [0, 0], sizes = [8, 128], strides = [1, 1]} : vector<8x384xf32> to vector<8x128xf32>
    %7 = arith.addf %5, %6 : vector<8x128xf32>
    %c0_8 = arith.constant 0 : index
    %c0_9 = arith.constant 0 : index
    %8 = vector.load %arg5[%c0_8, %c0_9] : memref<1x128xf32, #tpu.memory_space<vmem>>, vector<1x128xf32>
    %9 = vector.broadcast %8 : vector<1x128xf32> to vector<8x128xf32>
    %10 = arith.addf %7, %9 : vector<8x128xf32>
    %cst_10 = arith.constant 0.000000e+00 : f32
    %11 = vector.broadcast %cst_10 : f32 to vector<8x128xf32>
    %12 = arith.maximumf %10, %11 : vector<8x128xf32>
    %c0_11 = arith.constant 0 : index
    %c0_12 = arith.constant 0 : index
    %13 = vector.load %arg6[%c0_11, %c0_12] : memref<128x128xf32, #tpu.memory_space<vmem>>, vector<128x128xf32>
    %cst_13 = arith.constant dense<0.000000e+00> : vector<8x128xf32>
    %14 = tpu.matmul %12, %13, %cst_13 {dimension_numbers = #tpu.dot_dimension_numbers<[1], [0], [0], [1], [0, 0, 1, 1], [], []>} : vector<8x128xf32>, vector<128x128xf32>, vector<8x128xf32> -> vector<8x128xf32>
    %15 = vector.extract_strided_slice %3 {offsets = [0, 128], sizes = [8, 128], strides = [1, 1]} : vector<8x384xf32> to vector<8x128xf32>
    %16 = arith.addf %14, %15 : vector<8x128xf32>
    %c0_14 = arith.constant 0 : index
    %c0_15 = arith.constant 0 : index
    %17 = vector.load %arg7[%c0_14, %c0_15] : memref<1x128xf32, #tpu.memory_space<vmem>>, vector<1x128xf32>
    %18 = vector.broadcast %17 : vector<1x128xf32> to vector<8x128xf32>
    %19 = arith.addf %16, %18 : vector<8x128xf32>
    %20 = arith.negf %19 : vector<8x128xf32>
    %21 = math.exp %20 : vector<8x128xf32>
    %cst_16 = arith.constant 1.000000e+00 : f32
    %22 = vector.broadcast %cst_16 : f32 to vector<8x128xf32>
    %23 = arith.addf %22, %21 : vector<8x128xf32>
    %24 = arith.divf %22, %23 : vector<8x128xf32>
    %25 = arith.mulf %19, %24 : vector<8x128xf32>
    %c0_17 = arith.constant 0 : index
    %c0_18 = arith.constant 0 : index
    %26 = vector.load %arg8[%c0_17, %c0_18] : memref<128x128xf32, #tpu.memory_space<vmem>>, vector<128x128xf32>
    %cst_19 = arith.constant dense<0.000000e+00> : vector<8x128xf32>
    %27 = tpu.matmul %25, %26, %cst_19 {dimension_numbers = #tpu.dot_dimension_numbers<[1], [0], [0], [1], [0, 0, 1, 1], [], []>} : vector<8x128xf32>, vector<128x128xf32>, vector<8x128xf32> -> vector<8x128xf32>
    %28 = vector.extract_strided_slice %3 {offsets = [0, 256], sizes = [8, 128], strides = [1, 1]} : vector<8x384xf32> to vector<8x128xf32>
    %29 = arith.addf %27, %28 : vector<8x128xf32>
    %c0_20 = arith.constant 0 : index
    %c0_21 = arith.constant 0 : index
    %30 = vector.load %arg9[%c0_20, %c0_21] : memref<1x128xf32, #tpu.memory_space<vmem>>, vector<1x128xf32>
    %31 = vector.broadcast %30 : vector<1x128xf32> to vector<8x128xf32>
    %32 = arith.addf %29, %31 : vector<8x128xf32>
    %33 = math.tanh %32 : vector<8x128xf32>
    %c0_22 = arith.constant 0 : index
    %c0_23 = arith.constant 0 : index
    %34 = vector.load %arg10[%c0_22, %c0_23] : memref<8x128xf32, #tpu.memory_space<vmem>>, vector<8x128xf32>
    tpu.vector_store %arg10[%c0_22, %c0_23], %33 {strides = array<i32>} : memref<8x128xf32, #tpu.memory_space<vmem>>, vector<8x128xf32>,
    return
  }
  func.func @transform_0(%arg0: i32) -> (i32, i32) {
    %c0_i32 = arith.constant 0 : i32
    %c0_i32_0 = arith.constant 0 : i32
    return %arg0, %c0_i32 : i32, i32
  }
  func.func @transform_1(%arg0: i32) -> (i32, i32) {
    %c0_i32 = arith.constant 0 : i32
    %c0_i32_0 = arith.constant 0 : i32
    return %arg0, %c0_i32 : i32, i32
  }
  func.func @transform_2(%arg0: i32) -> (i32, i32) {
    %c0_i32 = arith.constant 0 : i32
    %c0_i32_0 = arith.constant 0 : i32
    %c0_i32_1 = arith.constant 0 : i32
    return %c0_i32, %c0_i32_0 : i32, i32
  }
  func.func @transform_3(%arg0: i32) -> (i32, i32) {
    %c0_i32 = arith.constant 0 : i32
    %c0_i32_0 = arith.constant 0 : i32
    %c0_i32_1 = arith.constant 0 : i32
    return %c0_i32, %c0_i32_0 : i32, i32
  }
  func.func @transform_4(%arg0: i32) -> (i32, i32) {
    %c0_i32 = arith.constant 0 : i32
    %c0_i32_0 = arith.constant 0 : i32
    %c0_i32_1 = arith.constant 0 : i32
    return %c0_i32, %c0_i32_0 : i32, i32
  }
  func.func @transform_5(%arg0: i32) -> (i32, i32) {
    %c0_i32 = arith.constant 0 : i32
    %c0_i32_0 = arith.constant 0 : i32
    %c0_i32_1 = arith.constant 0 : i32
    return %c0_i32, %c0_i32_0 : i32, i32
  }
  func.func @transform_6(%arg0: i32) -> (i32, i32) {
    %c0_i32 = arith.constant 0 : i32
    %c0_i32_0 = arith.constant 0 : i32
    %c0_i32_1 = arith.constant 0 : i32
    return %c0_i32, %c0_i32_0 : i32, i32
  }
  func.func @transform_7(%arg0: i32) -> (i32, i32) {
    %c0_i32 = arith.constant 0 : i32
    %c0_i32_0 = arith.constant 0 : i32
    %c0_i32_1 = arith.constant 0 : i32
    return %c0_i32, %c0_i32_0 : i32, i32
  }
  func.func @transform_8(%arg0: i32) -> (i32, i32) {
    %c0_i32 = arith.constant 0 : i32
    %c0_i32_0 = arith.constant 0 : i32
    %c0_i32_1 = arith.constant 0 : i32
    return %c0_i32, %c0_i32_0 : i32, i32
  }
  func.func @transform_9(%arg0: i32) -> (i32, i32) {
    %c0_i32 = arith.constant 0 : i32
    %c0_i32_0 = arith.constant 0 : i32
    return %arg0, %c0_i32 : i32, i32
  }
}

</mosaic_0001>

<bundles_post_ra>
// kernel: tpu_custom_call.1
= control target key start
LH: loop header
LB: loop body
LE: loop exit
PB: predicated region body
PF: predicated region fallthrough
CT: control target
= control target key end

     0   :  { %s2247_s0 = inlined_call_operand.hbm [shape: f32[16,128], index: 0, kind: input, shape index: {}]   ;;  %s2248_s1 = inlined_call_operand.hbm [shape: f32[16,128], index: 1, kind: input, shape index: {}]   ;;  %s2249_s2 = inlined_call_operand.hbm [shape: f32[128,384], index: 2, kind: input, shape index: {}]   ;;  %s2250_s3 = inlined_call_operand.hbm [shape: f32[128,128], index: 3, kind: input, shape index: {}]   ;;  %s2251_s4 = inlined_call_operand.vmem [shape: f32[1,128], index: 4, kind: input, shape index: {}]   ;;  %s2252_s5 = inlined_call_operand.hbm [shape: f32[128,128], index: 5, kind: input, shape index: {}]   ;;  %s2253_s6 = inlined_call_operand.vmem [shape: f32[1,128], index: 6, kind: input, shape index: {}]   ;;  %s2254_s7 = inlined_call_operand.hbm [shape: f32[128,128], index: 7, kind: input, shape index: {}]   ;;  %s2255_s8 = inlined_call_operand.vmem [shape: f32[1,128], index: 8, kind: input, shape index: {}]   ;;  %s2256_s9 = inlined_call_operand.hbm [shape: f32[16,128], index: 9, kind: output, shape index: {}]  }
   0x1   :  { %2262 = sst [smem:[#allocation21_spill]] %s2249_s2 }
   0x2   :  { %2263 = sst [smem:[#allocation22_spill]] %s2250_s3 }
   0x3   :  { %2264 = sst [smem:[#allocation23_spill]] %s2252_s5 }
   0x4   :  { %2265 = sst [smem:[#allocation24_spill]] %s2254_s7 }
   0x5   :  { %2266 = sst [smem:[#allocation25_spill]] %s2256_s9 }
   0x6   :  { %14 = vsyncpa [#allocation3], 0 }
   0x7   :  { %16 = vsyncpa [#allocation3 + $0x1], 0 }
   0x8   :  { %17 = vsyncpa [#allocation6], 0 }
   0x9   :  { %19 = vsyncpa [#allocation6 + $0x1], 0 }
   0xa   :  { %20 = vsyncpa [#allocation9], 0 }
   0xb   :  { %21 = vsyncpa [#allocation12], 0 }
   0xc   :  { %22 = vsyncpa [#allocation4], 0 }
   0xd   :  { %24 = vsyncpa [#allocation4 + $0x1], 0  ;;  %s1859_s30 = smov 0   ;;  %s1861_s10 = smov 0  }
   0xe   :  { %s1863_s11 = smov 0   ;;  %s1865_s12 = smov 0  }
   0xf LB: > { %s1795_s13 = smov [#allocation7]   ;;  %s1880_s15 = sadd.s32 4294967295, %s1793_s12   ;;  %s1793_s12 = sphi %s1865_s12, %s2297_s12   ;;  %s1789_s11 = sphi %s1863_s11, %s2296_s11   ;;  %s1785_s10 = sphi %s1861_s10, %s2295_s10   ;;  %s1781_s30 = sphi %s1859_s30, %s2294_s30  }
  0x10   : > { %s272_s14 = sshll.u32 %s1795_s13, 4  ;;  %p1072_p0 = scmp.ge.s32.totalorder %s1793_s12, 1  ;;  %s1885_s14 = int_to_ptr.vmem [resolvable:$true] %s272_s14 }
  0x11   : > { %p2258_p1 = scmp.eq.s32.totalorder %s1880_s15, 0  ;;  %p260_p2 = scmp.lt.s32.totalorder %s1793_s12, 3 }
  0x12   : > { %s1796_s17 = smov [#allocation8]   ;;  %s1797_s20 = smov [#allocation10]  }
  0x13   : > { %p1887_p3 = pnand %p1072_p0, %p260_p2  ;;  %s285_s18 = sshll.u32 %s1796_s17, 4  ;;  %s1900_s18 = int_to_ptr.vmem [resolvable:$true] %s285_s18 }
  0x14   : > { %s1902_s21 = sshll.u32 %s1797_s20, 4  ;;  %s2269_s2 = sld [smem:[#allocation21_spill]]  ;;  %s302_s21 = int_to_ptr.vmem [resolvable:$true] %s1902_s21 }
  0x15   : > { %s2267_s16 = scalar_select %p1887_p3, 1, 0 }
  0x16   : > { %p1456_p5 = pneg %p1887_p3 }
  0x18   : > { %p1896_p6 = pnand %p1456_p5, %p2258_p1 }
  0x1a   : > { %s1539_s24 = scalar_lea.hbm %s2269_s2, 6144  ;;  %p1912_p8 = pneg %p1896_p6 }
  0x1b   : > { %p1540_p7 = scmp.ne.s32.totalorder %s2269_s2, %s1539_s24  ;;  %p1546_p11 = scmp.lt.u32.totalorder %s1539_s24, %s2269_s2 }
  0x1d   : > { %p1542_p9 = pnand %p1912_p8, %p1540_p7 }
  0x1f   : > { %p1543_p10 = pneg %p1542_p9 }
  0x21   : > { %p1548_p12 = pnand %p1546_p11, %p1543_p10 }
  0x23   : > { %1551 = shalt.err (!%p1548_p12)
}
  0x24   : > { %s1552_s13 = scalar_lea.vmem %s1885_s14, 6144  ;;  %p1560_p5 = scmp.lt.s32.totalorder %s1885_s14, %s1885_s14 }
  0x25   : > { %p1553_p13 = scmp.ne.s32.totalorder %s1885_s14, %s1552_s13  ;;  %p1561_p4 = scmp.lt.s32.totalorder %s1552_s13, %s1552_s13 }
  0x27   : > { %p1555_p0 = pnand %p1553_p13, %p1912_p8  ;;  %p1562_p7 = por %p1561_p4, %p1560_p5 }
  0x29   : > { %p1556_p2 = pneg %p1555_p0 }
  0x2b   : > { %p1563_p9 = pnand %p1562_p7, %p1556_p2 }
  0x2d   : > { %1566 = shalt.err (!%p1563_p9)
}
  0x2e   : > { %s1798_s17 = smov 384   ;;  %s1799_s20 = smov 24  }
  0x2f   : > { %1459 = dma.hbm_to_vmem [thread:$0]  (!%p1896_p6), %s2269_s2, 6144, %s1885_s14, [#allocation6], %s1798_s17, %s1798_s17, %s1799_s20  }
  0x30   : > { %s2271_s3 = sld [smem:[#allocation22_spill]] }
  0x36   : > { %s1567_s26 = scalar_lea.hbm %s2271_s3, 2048 }
  0x37   : > { %p1568_p4 = scmp.ne.s32.totalorder %s2271_s3, %s1567_s26  ;;  %p1574_p12 = scmp.lt.u32.totalorder %s1567_s26, %s2271_s3 }
  0x39   : > { %p1570_p10 = pnand %p1568_p4, %p1912_p8 }
  0x3b   : > { %p1571_p11 = pneg %p1570_p10 }
  0x3d   : > { %p1576_p13 = pnand %p1574_p12, %p1571_p11 }
  0x3f   : > { %1579 = shalt.err (!%p1576_p13)
}
  0x40   : > { %s1580_s14 = scalar_lea.vmem %s1900_s18, 2048  ;;  %p1588_p7 = scmp.lt.s32.totalorder %s1900_s18, %s1900_s18 }
  0x41   : > { %p1581_p0 = scmp.ne.s32.totalorder %s1900_s18, %s1580_s14  ;;  %p1589_p9 = scmp.lt.s32.totalorder %s1580_s14, %s1580_s14 }
  0x43   : > { %p1583_p2 = pnand %p1581_p0, %p1912_p8  ;;  %p1590_p4 = por %p1589_p9, %p1588_p7 }
  0x45   : > { %p1584_p5 = pneg %p1583_p2 }
  0x47   : > { %p1591_p10 = pnand %p1590_p4, %p1584_p5 }
  0x49   : > { %1594 = shalt.err (!%p1591_p10)
}
  0x4a   : > { %s1800_s17 = smov 128   ;;  %s1801_s9 = smov 8  }
  0x4b   : > { %1462 = dma.hbm_to_vmem [thread:$0]  (!%p1896_p6), %s2271_s3, 2048, %s1900_s18, [#allocation9], %s1800_s17, %s1800_s17, %s1801_s9  }
  0x4c   : > { %s2272_s5 = sld [smem:[#allocation23_spill]] }
  0x52   : > { %s1595_s25 = scalar_lea.hbm %s2272_s5, 2048 }
  0x53   : > { %p1596_p11 = scmp.ne.s32.totalorder %s2272_s5, %s1595_s25  ;;  %p1602_p0 = scmp.lt.u32.totalorder %s1595_s25, %s2272_s5 }
  0x55   : > { %p1598_p12 = pnand %p1596_p11, %p1912_p8 }
  0x57   : > { %p1599_p13 = pneg %p1598_p12 }
  0x59   : > { %p1604_p2 = pnand %p1602_p0, %p1599_p13 }
  0x5b   : > { %1607 = shalt.err (!%p1604_p2)
}
  0x5c   : > { %s1608_s14 = scalar_lea.vmem %s302_s21, 2048  ;;  %p1616_p4 = scmp.lt.s32.totalorder %s302_s21, %s302_s21 }
  0x5d   : > { %p1609_p5 = scmp.ne.s32.totalorder %s302_s21, %s1608_s14  ;;  %p1617_p10 = scmp.lt.s32.totalorder %s1608_s14, %s1608_s14 }
  0x5f   : > { %p1611_p7 = pnand %p1609_p5, %p1912_p8  ;;  %p1618_p1 = por %p1617_p10, %p1616_p4 }
  0x61   : > { %p1612_p9 = pneg %p1611_p7 }
  0x63   : > { %p1619_p3 = pnand %p1618_p1, %p1612_p9 }
  0x65   : > { %1622 = shalt.err (!%p1619_p3)
}
  0x66   : > { %1465 = dma.hbm_to_vmem [thread:$0]  (!%p1896_p6), %s2272_s5, 2048, %s302_s21, [#allocation9], %s1800_s17, %s1800_s17, %s1801_s9  }
  0x67   : > { %s1802_s22 = smov [#allocation11]   ;;  %s2273_s7 = sld [smem:[#allocation24_spill]] }
  0x68   : > { %s317_s23 = sshll.u32 %s1802_s22, 4  ;;  %s318_s23 = int_to_ptr.vmem [resolvable:$true] %s317_s23 }
  0x6d   : > { %s1623_s26 = scalar_lea.hbm %s2273_s7, 2048 }
  0x6e   : > { %p1624_p1 = scmp.ne.s32.totalorder %s2273_s7, %s1623_s26  ;;  %p1630_p12 = scmp.lt.u32.totalorder %s1623_s26, %s2273_s7 }
  0x70   : > { %p1626_p3 = pnand %p1624_p1, %p1912_p8 }
  0x72   : > { %p1627_p11 = pneg %p1626_p3 }
  0x74   : > { %p1632_p13 = pnand %p1630_p12, %p1627_p11 }
  0x76   : > { %1635 = shalt.err (!%p1632_p13)
}
  0x77   : > { %s1636_s21 = scalar_lea.vmem %s318_s23, 2048  ;;  %p1644_p7 = scmp.lt.s32.totalorder %s318_s23, %s318_s23 }
  0x78   : > { %p1637_p0 = scmp.ne.s32.totalorder %s318_s23, %s1636_s21  ;;  %p1645_p9 = scmp.lt.s32.totalorder %s1636_s21, %s1636_s21 }
  0x7a   : > { %p1639_p2 = pnand %p1637_p0, %p1912_p8  ;;  %p1646_p4 = por %p1645_p9, %p1644_p7 }
  0x7c   : > { %p1640_p5 = pneg %p1639_p2 }
  0x7e   : > { %p1647_p10 = pnand %p1646_p4, %p1640_p5 }
  0x80   : > { %1650 = shalt.err (!%p1647_p10)
}
  0x81   : > { %1468 = dma.hbm_to_vmem [thread:$0]  (!%p1896_p6), %s2273_s7, 2048, %s318_s23, [#allocation12], %s1800_s17, %s1800_s17, %s1801_s9  }
  0x82   : > { %s1071_s19 = sadd.s32 4294967294, %s1793_s12   ;;  %s2004_s27 = sadd.s32 1, %s1793_s12  }
  0x83   : > { %s34_s22 = ssub.s32 %s1793_s12, %s2004_s27  ;;  %s37_s24 = sadd.s32 1, %s1789_s11 }
  0x84   : > { %p35_p8 = scmp.eq.s32.totalorder %s34_s22, 0  ;;  %p44_p1 = scmp.ne.s32.totalorder %s1789_s11, %s1785_s10 }
  0x85   : > { %p45_p3 = scmp.eq.s32.totalorder %s1793_s12, 0  ;;  %p50_p11 = scmp.ne.s32.totalorder %s1785_s10, %s1781_s30 }
  0x86   : > { %s2015_s25 = scalar_select %p35_p8, %s1789_s11, %s37_s24  }
  0x87   : > { %p2017_p12 = por %p45_p3, %p44_p1  ;;  %p2276_p13 = scmp.eq.s32.totalorder %s1880_s15, 0 }
  0x88   : > { %2274 = sst [smem:[#allocation20_spill]] %s2015_s25  ;;  %p247_p0 = scmp.eq.s32.totalorder %s1880_s15, 1 }
  0x89   : > { %p2023_p6 = por %p2276_p13, %p50_p11  ;;  %p253_p2 = scmp.eq.s32.totalorder %s1071_s19, 1 }
  0x8a   : > { %p1484_p5 = scmp.lt.s32.totalorder %s1793_s12, 2  ;;  %s334_s9 = sand.u32 1, %s1789_s11  }
  0x8b   : > { %s2277_s17 = scalar_select %p2023_p6, 1, 0 }
  0x8c   : > { %p2030_p7 = por %p247_p0, %p44_p1  ;;  %p2034_p9 = por %p253_p2, %p50_p11 }
  0x8d   : > { %s2038_s29 = sshll.u32 %s334_s9, 3  ;;  %s1079_s13 = sshll.u32 %s1793_s12, 7 }
  0x8e   : > { %s2278_s23 = scalar_select %p2030_p7, 1, 0 }
  0x8f   : > { %s2279_s28 = scalar_select %p2034_p9, 1, 0 }
  0x90   : > { %s2044_s18 = scalar_lea.hbm %s2247_s0, %s1079_s13  ;;  %s338_s20 = scalar_lea.vmem [#allocation2], %s2038_s29 }
  0x91   : > { %s345_s19 = sshll.u32 %s338_s20, 4  ;;  %p2051_p4 = pnand %p1484_p5, %p2017_p12  ;;  %s2047_s19 = int_to_ptr.vmem [resolvable:$true] %s345_s19 }
  0x92   : > { %s2058_s14 = scalar_lea.hbm %s2248_s1, %s1079_s13  ;;  %s352_s21 = sand.u32 1, %s1793_s12  }
  0x93   : > { %s335_s3 = scalar_lea.sflag [#allocation3], %s334_s9  ;;  %s1651_s5 = scalar_lea.hbm %s2044_s18, 128 }
  0x94   : > { %p1652_p10 = scmp.ne.s32.totalorder %s2044_s18, %s1651_s5  ;;  %p1653_p8 = pneg %p2051_p4 }
  0x95   : > { %s1656_s7 = scalar_lea.hbm %s2247_s0, 256  ;;  %p1657_p11 = scmp.lt.u32.totalorder %s2044_s18, %s2247_s0 }
  0x96   : > { %p1654_p1 = pnand %p1653_p8, %p1652_p10  ;;  %p1658_p12 = scmp.lt.u32.totalorder %s1656_s7, %s1651_s5 }
  0x97   : > { %p1660_p0 = scmp.lt.u32.totalorder %s1651_s5, %s2044_s18 }
  0x98   : > { %p1655_p3 = pneg %p1654_p1  ;;  %p1659_p13 = por %p1658_p12, %p1657_p11 }
  0x9a   : > { %p1661_p2 = por %p1660_p0, %p1659_p13 }
  0x9c   : > { %p1662_p5 = pnand %p1661_p2, %p1655_p3 }
  0x9e   : > { %1665 = shalt.err (!%p1662_p5)
}
  0x9f   : > { %s1666_s9 = scalar_lea.vmem %s2047_s19, 128  ;;  %s1803_s13 = smov [#allocation2]  }
  0xa0   : > { %p1667_p10 = scmp.ne.s32.totalorder %s2047_s19, %s1666_s9  ;;  %s1671_s24 = sshll.u32 %s1803_s13, 4  ;;  %s1672_s24 = int_to_ptr.vmem [resolvable:$false] %s1671_s24 }
  0xa1   : > { %s1673_s25 = scalar_lea.vmem %s1672_s24, 256  ;;  %p1674_p7 = scmp.lt.s32.totalorder %s2047_s19, %s1672_s24 }
  0xa2   : > { %p1669_p1 = pnand %p1667_p10, %p1653_p8  ;;  %p1675_p11 = scmp.lt.s32.totalorder %s1673_s25, %s1666_s9 }
  0xa4   : > { %p1670_p9 = pneg %p1669_p1  ;;  %p1676_p12 = por %p1675_p11, %p1674_p7 }
  0xa6   : > { %p1677_p13 = pnand %p1676_p12, %p1670_p9 }
  0xa8   : > { %1680 = shalt.err (!%p1677_p13)
}
  0xa9   : > { %1472 = dma.hbm_to_vmem [thread:$0]  (!%p2051_p4), %s2044_s18, 128, %s2047_s19, %s335_s3  }
  0xaa   : > { %s356_s5 = scalar_lea.vmem [#allocation5], %s2038_s29  ;;  %s353_s26 = scalar_lea.sflag [#allocation6], %s352_s21 }
  0xab   : > { %s363_s7 = sshll.u32 %s356_s5, 4  ;;  %s1681_s20 = scalar_lea.hbm %s2058_s14, 128  ;;  %s364_s7 = int_to_ptr.vmem [resolvable:$true] %s363_s7 }
  0xac   : > { %p1682_p7 = scmp.ne.s32.totalorder %s2058_s14, %s1681_s20  ;;  %s1686_s13 = scalar_lea.hbm %s2248_s1, 256 }
  0xad   : > { %p1687_p0 = scmp.lt.u32.totalorder %s2058_s14, %s2248_s1  ;;  %p1688_p2 = scmp.lt.u32.totalorder %s1686_s13, %s1681_s20 }
  0xae   : > { %p1684_p9 = pnand %p1682_p7, %p1653_p8  ;;  %p1690_p10 = scmp.lt.u32.totalorder %s1681_s20, %s2058_s14 }
  0xaf   : > { %p1689_p5 = por %p1688_p2, %p1687_p0 }
  0xb0   : > { %p1685_p3 = pneg %p1684_p9 }
  0xb1   : > { %p1691_p1 = por %p1690_p10, %p1689_p5 }
  0xb3   : > { %p1692_p11 = pnand %p1691_p1, %p1685_p3 }
  0xb5   : > { %1695 = shalt.err (!%p1692_p11)
}
  0xb6   : > { %s1696_s3 = scalar_lea.vmem %s364_s7, 128  ;;  %s1804_s29 = smov [#allocation5]  }
  0xb7   : > { %p1697_p12 = scmp.ne.s32.totalorder %s364_s7, %s1696_s3  ;;  %s1701_s18 = sshll.u32 %s1804_s29, 4  ;;  %s1702_s18 = int_to_ptr.vmem [resolvable:$false] %s1701_s18 }
  0xb8   : > { %s1703_s19 = scalar_lea.vmem %s1702_s18, 256  ;;  %p1704_p9 = scmp.lt.s32.totalorder %s364_s7, %s1702_s18 }
  0xb9   : > { %p1699_p13 = pnand %p1697_p12, %p1653_p8  ;;  %p1705_p6 = scmp.lt.s32.totalorder %s1703_s19, %s1696_s3 }
  0xbb   : > { %p1700_p7 = pneg %p1699_p13  ;;  %p1706_p0 = por %p1705_p6, %p1704_p9 }
  0xbd   : > { %p1707_p2 = pnand %p1706_p0, %p1700_p7 }
  0xbf   : > { %1710 = shalt.err (!%p1707_p2)
}
  0xc0   : > { %1475 = dma.hbm_to_vmem [thread:$0]  (!%p2051_p4), %s2058_s14, 128, %s364_s7, %s353_s26  }
  0xc1   : > { %p2281_p3 = scmp.ne.s32.totalorder %s2267_s16, 0 }
  0xc2   : > { %s2111_s21 = sand.u32 (!%p2281_p3), 1, %s1785_s10   ;;  %p2282_p6 = scmp.ne.s32.totalorder (!%p2281_p3), %s2277_s17, 0 }
  0xc3   : > { %372 = sbr.rel (%p2281_p3) target bundleno = 985 (0x3d9), region = 56  ;;  %s2114_s5 = sshll.u32 (!%p2281_p3), %s2111_s21, 3 }
  0xc4   : > { %s375_s20 = scalar_lea.sflag (!%p2281_p3), [#allocation3], %s2111_s21  ;;  %s378_s2 = scalar_lea.vmem (!%p2281_p3), [#allocation2], %s2114_s5 }
  0xca   : > { %1756 = dma.done.wait (%p2282_p6), %s375_s20, 128  }
  0xcb   : > { %1758 = vsyncadd (%p2282_p6), %s375_s20, 4294967168  ;;  %s383_s16 = sand.u32 1, %s1880_s15   ;;  %s387_s14 = scalar_lea.vmem [#allocation5], %s2114_s5 }
  0xcc   : > { %s384_s22 = scalar_lea.sflag [#allocation6], %s383_s16 }
  0xcd   : > { %1760 = dma.done.wait (%p2282_p6), %s384_s22, 128  }
  0xce   : > { %1762 = vsyncadd (%p2282_p6), %s384_s22, 4294967168  ;;  %p2283_p4 = scmp.eq.s32.totalorder %s1880_s15, 0 }
  0xd0   : > { %1764 = dma.done.wait (%p2283_p4), [#allocation6], 6144   ;;  %p2284_p8 = pmov %p2283_p4 }
  0xd1   : > { %p2285_p5 = pmov %p2283_p4 }
  0xd2   : > { %1766 = vsyncadd (%p2284_p8), [#allocation6], 4294961152 }
  0xd3   : > { %1768 = dma.done.wait (%p2285_p5), [#allocation9], 4096   ;;  %p2286_p10 = pmov %p2283_p4 }
  0xd4   : > { %p2287_p1 = pmov %p2283_p4 }
  0xd5   : > { %1770 = vsyncadd (%p2286_p10), [#allocation9], 4294963200 }
  0xd6   : > { %1772 = dma.done.wait (%p2287_p1), [#allocation12], 2048   ;;  %p2288_p11 = pmov %p2287_p1 }
  0xd7   : > { %v1805_v0 = vmov 0.0   ;;  %v1806_v1 = vmov 0.0|0.0   ;;  %vm1807_vm0 = vmmov 0   ;;  %v446_v2 = vld [vmem:[#allocation7 + $0x8] sm:$0xff]  ;;  %v449_v3 = vld [vmem:[#allocation7 + $0x20] sm:$0xff]  ;;  %v448_v6 = vld [vmem:[#allocation7 + $0x18] sm:$0xff] }
  0xd8   : > { %1774 = vsyncadd (%p2288_p11), [#allocation12], 4294965248  ;;  %557 = vmatprep.mubr.f32.mxu0 %v1805_v0  ;;  %1338 = vmatprep.subr.bf16.mxu1 %v1806_v1  ;;  %v445_v4 = vld [vmem:[#allocation7] sm:$0xff]  ;;  %v1306_v5 = vpack.c.bf16 %v449_v3, %v446_v2  ;;  %v452_v7 = vld [vmem:[#allocation7 + $0x38] sm:$0xff]  ;;  %s1095_s25 = sshll.u32 %s1880_s15, 7  ;;  %s442_s3 = scalar_lea.vmem [#allocation13], %s2114_s5 }
  0xd9   : > { %1198 = vmatprep.mubr.msk.f32.mxu1 %vm1807_vm0, %v1805_v0  ;;  %v455_v8 = vld [vmem:[#allocation7 + $0x50] sm:$0xff]  ;;  %v1308_v9 = vpack.c.bf16 %v448_v6, %v445_v4  ;;  %v454_v12 = vld [vmem:[#allocation7 + $0x48] sm:$0xff]  ;;  %v461_v14 = vld [vmem:[#allocation7 + $0x80] sm:$0xff]  ;;  %s940_s29 = sshll.u32 %s442_s3, 4  ;;  %s2289_s20 = sld [smem:[#allocation25_spill]]  ;;  %s2205_s29 = int_to_ptr.vmem [resolvable:$true] %s940_s29 }
  0xda   : > { %v1310_v10 = vpack.c.bf16 %v455_v8, %v452_v7  ;;  %v451_v11 = vld [vmem:[#allocation7 + $0x30] sm:$0xff]  ;;  %v458_v13 = vld [vmem:[#allocation7 + $0x68] sm:$0xff]  ;;  %1307 = vmatprep.subr.bf16.mxu0 %v1306_v5  ;;  %v457_v17 = vld [vmem:[#allocation7 + $0x60] sm:$0xff]  ;;  %s927_s16 = scalar_lea.sflag [#allocation4], %s2111_s21  ;;  %s1711_s22 = scalar_lea.vmem %s2205_s29, 128 }
  0xdb   : > { %1309 = vmatpush1.bf16.msra.mxu0 %v1308_v9  ;;  %v1312_v15 = vpack.c.bf16 %v454_v12, %v451_v11  ;;  %v1314_v16 = vpack.c.bf16 %v461_v14, %v458_v13  ;;  %v460_v18 = vld [vmem:[#allocation7 + $0x78] sm:$0xff]  ;;  %v467_v20 = vld [vmem:[#allocation7 + $0xb0] sm:$0xff]  ;;  %v466_v24 = vld [vmem:[#allocation7 + $0xa8] sm:$0xff]  ;;  %p1712_p12 = scmp.ne.s32.totalorder %s2205_s29, %s1711_s22  ;;  %p2290_p13 = scmp.ne.s32.totalorder %s2278_s23, 0 }
  0xdc   : > { %1311 = vmatprep.subr.bf16.mxu0 %v1310_v10  ;;  %v464_v19 = vld [vmem:[#allocation7 + $0x98] sm:$0xff]  ;;  %v1316_v21 = vpack.c.bf16 %v460_v18, %v457_v17  ;;  %v463_v23 = vld [vmem:[#allocation7 + $0x90] sm:$0xff]  ;;  %v470_v25 = vld [vmem:[#allocation7 + $0xc8] sm:$0xff]  ;;  %s1808_s15 = smov [#allocation13]  }
  0xdd   : > { %v1318_v22 = vpack.c.bf16 %v467_v20, %v464_v19  ;;  %v473_v26 = vld [vmem:[#allocation7 + $0xe0] sm:$0xff]  ;;  %v1320_v27 = vpack.c.bf16 %v466_v24, %v463_v23  ;;  %v472_v30 = vld [vmem:[#allocation7 + $0xd8] sm:$0xff]  ;;  %v479_v32 = vld [vmem:[#allocation7 + $0x110] sm:$0xff]  ;;  %p1713_p7 = pnand %p1712_p12, %p2290_p13  ;;  %s1715_s5 = sshll.u32 %s1808_s15, 4  ;;  %s1716_s5 = int_to_ptr.vmem [resolvable:$false] %s1715_s5 }
  0xde   : > { %v1322_v28 = vpack.c.bf16 %v473_v26, %v470_v25  ;;  %v469_v29 = vld [vmem:[#allocation7 + $0xc0] sm:$0xff]  ;;  %v476_v31 = vld [vmem:[#allocation7 + $0xf8] sm:$0xff]  ;;  %v475_v34 = vld [vmem:[#allocation7 + $0xf0] sm:$0xff]  ;;  %p1718_p0 = scmp.lt.s32.totalorder %s2205_s29, %s1716_s5 }
  0xdf   : > { %1313 = vmatpush1.bf16.msra.mxu0 %v1312_v15  ;;  %v1324_v33 = vpack.c.bf16 %v472_v30, %v469_v29  ;;  %v478_v35 = vld [vmem:[#allocation7 + $0x108] sm:$0xff]  ;;  %v447_v36 = vld [vmem:[#allocation7 + $0x10] sm:$0xff]  ;;  %v1326_v37 = vpack.c.bf16 %v479_v32, %v476_v31  ;;  %v453_v39 = vld [vmem:[#allocation7 + $0x40] sm:$0xff]  ;;  %p1714_p9 = pneg %p1713_p7 }
  0xe0   : > { %1315 = vmatprep.subr.bf16.mxu0 %v1314_v16  ;;  %v450_v38 = vld [vmem:[#allocation7 + $0x28] sm:$0xff]  ;;  %v456_v40 = vld [vmem:[#allocation7 + $0x58] sm:$0xff]  ;;  %v485_v42 = vld [vmem:[#allocation7 + $0x140] sm:$0xff]  ;;  %v1328_v44 = vpack.c.bf16 %v478_v35, %v475_v34 }
  0xe1   : > { %v482_v41 = vld [vmem:[#allocation7 + $0x128] sm:$0xff]  ;;  %v1339_v43 = vpack.c.bf16 %v450_v38, %v447_v36  ;;  %v481_v45 = vld [vmem:[#allocation7 + $0x120] sm:$0xff]  ;;  %v1342_v46 = vpack.c.bf16 %v456_v40, %v453_v39  ;;  %v484_v48 = vld [vmem:[#allocation7 + $0x138] sm:$0xff] }
  0xe2   : > { %v1330_v47 = vpack.c.bf16 %v485_v42, %v482_v41  ;;  %v459_v49 = vld [vmem:[#allocation7 + $0x70] sm:$0xff]  ;;  %v462_v50 = vld [vmem:[#allocation7 + $0x88] sm:$0xff]  ;;  %v488_v51 = vld [vmem:[#allocation7 + $0x158] sm:$0xff]  ;;  %v1332_v53 = vpack.c.bf16 %v484_v48, %v481_v45 }
  0xe3   : > { %1317 = vmatpush1.bf16.msra.mxu0 %v1316_v21  ;;  %1340 = vmatpush3.bf16.msra.mxu1 %v1339_v43  ;;  %v491_v52 = vld [vmem:[#allocation7 + $0x170] sm:$0xff]  ;;  %v1345_v55 = vpack.c.bf16 %v462_v50, %v459_v49  ;;  %v490_v57 = vld [vmem:[#allocation7 + $0x168] sm:$0xff]  ;;  %v465_v58 = vld [vmem:[#allocation7 + $0xa0] sm:$0xff] }
  0xe4   : > { %1319 = vmatprep.subr.bf16.mxu0 %v1318_v22  ;;  %1341 = vmatprep.subr.bf16.mxu1 %v1806_v1  ;;  %v487_v54 = vld [vmem:[#allocation7 + $0x150] sm:$0xff]  ;;  %v1334_v56 = vpack.c.bf16 %v491_v52, %v488_v51  ;;  %v468_v59 = vld [vmem:[#allocation7 + $0xb8] sm:$0xff]  ;;  %v634_v62 = vld [vmem:[#allocation8] sm:$0xff] }
  0xe5   : > { %v1336_v60 = vpack.c.bf16 %v490_v57, %v487_v54  ;;  %v1348_v61 = vpack.c.bf16 %v468_v59, %v465_v58  ;;  %v635_v63 = vld [vmem:[#allocation8 + $0x8] sm:$0xff]  ;;  %v471_v2 = vld [vmem:[#allocation7 + $0xd0] sm:$0xff]  ;;  %v637_v7 = vld [vmem:[#allocation8 + $0x18] sm:$0xff] }
  0xe6   : > { %v474_v3 = vld [vmem:[#allocation7 + $0xe8] sm:$0xff]  ;;  %v2149_v4 = vld [vmem:[%s387_s14] sm:$0xff]  ;;  %v1363_v5 = vpack.c.bf16 %v635_v63, %v634_v62  ;;  %v477_v9 = vld [vmem:[#allocation7 + $0x100] sm:$0xff]  ;;  %s1717_s14 = scalar_lea.vmem %s1716_s5, 256 }
  0xe7   : > { %1321 = vmatpush1.bf16.msra.mxu0 %v1320_v27  ;;  %1343 = vmatpush3.bf16.msra.mxu1 %v1342_v46  ;;  %v636_v6 = vld [vmem:[#allocation8 + $0x10] sm:$0xff]  ;;  %v1351_v8 = vpack.c.bf16 %v474_v3, %v471_v2  ;;  %v480_v10 = vld [vmem:[#allocation7 + $0x118] sm:$0xff]  ;;  %v638_v12 = vld [vmem:[#allocation8 + $0x20] sm:$0xff]  ;;  %p1719_p2 = scmp.lt.s32.totalorder %s1717_s14, %s1711_s22 }
  0xe8   : > { %1323 = vmatprep.subr.bf16.mxu0 %v1322_v28  ;;  %1344 = vmatprep.subr.bf16.mxu1 %v1806_v1  ;;  %v1366_v11 = vpack.c.bf16 %v637_v7, %v636_v6  ;;  %v639_v13 = vld [vmem:[#allocation8 + $0x28] sm:$0xff]  ;;  %v1354_v14 = vpack.c.bf16 %v480_v10, %v477_v9  ;;  %v640_v16 = vld [vmem:[#allocation8 + $0x30] sm:$0xff]  ;;  %v641_v17 = vld [vmem:[#allocation8 + $0x38] sm:$0xff] }
  0xe9   : > { %v1369_v15 = vpack.c.bf16 %v639_v13, %v638_v12  ;;  %v1372_v18 = vpack.c.bf16 %v641_v17, %v640_v16  ;;  %v642_v19 = vld [vmem:[#allocation8 + $0x40] sm:$0xff]  ;;  %v643_v20 = vld [vmem:[#allocation8 + $0x48] sm:$0xff]  ;;  %v644_v22 = vld [vmem:[#allocation8 + $0x50] sm:$0xff]  ;;  %p1720_p3 = por %p1719_p2, %p1718_p0 }
  0xea   : > { %v1375_v21 = vpack.c.bf16 %v643_v20, %v642_v19  ;;  %v645_v23 = vld [vmem:[#allocation8 + $0x58] sm:$0xff]  ;;  %v646_v25 = vld [vmem:[#allocation8 + $0x60] sm:$0xff]  ;;  %v647_v26 = vld [vmem:[#allocation8 + $0x68] sm:$0xff] }
  0xeb   : > { %1325 = vmatpush1.bf16.msra.mxu0 %v1324_v33  ;;  %1346 = vmatpush3.bf16.msra.mxu1 %v1345_v55  ;;  %v1378_v24 = vpack.c.bf16 %v645_v23, %v644_v22  ;;  %v1381_v27 = vpack.c.bf16 %v647_v26, %v646_v25  ;;  %v648_v28 = vld [vmem:[#allocation8 + $0x70] sm:$0xff]  ;;  %v649_v29 = vld [vmem:[#allocation8 + $0x78] sm:$0xff]  ;;  %v443_v31 = vld [vmem:[%s378_s2] sm:$0xff]  ;;  %s2203_s2 = scalar_lea.hbm %s2289_s20, %s1095_s25  ;;  %p1721_p6 = pnand %p1720_p3, %p1714_p9 }
  0xec   : > { %1327 = vmatprep.subr.bf16.mxu0 %v1326_v37  ;;  %1347 = vmatprep.subr.bf16.mxu1 %v1806_v1  ;;  %v1384_v30 = vpack.c.bf16 %v649_v29, %v648_v28  ;;  %v483_v32 = vld [vmem:[#allocation7 + $0x130] sm:$0xff]  ;;  %v486_v33 = vld [vmem:[#allocation7 + $0x148] sm:$0xff]  ;;  %v489_v35 = vld [vmem:[#allocation7 + $0x160] sm:$0xff] }
  0xed   : > { %v1357_v34 = vpack.c.bf16 %v486_v33, %v483_v32  ;;  %v492_v36 = vld [vmem:[#allocation7 + $0x178] sm:$0xff]  ;;  %v729_v37 = vld [vmem:[#allocation10] sm:$0xff]  ;;  %v730_v39 = vld [vmem:[#allocation10 + $0x8] sm:$0xff] }
  0xee   : > { %v1360_v38 = vpack.c.bf16 %v492_v36, %v489_v35  ;;  %v1387_v40 = vpack.c.bf16 %v730_v39, %v729_v37  ;;  %v731_v41 = vld [vmem:[#allocation10 + $0x10] sm:$0xff]  ;;  %v732_v42 = vld [vmem:[#allocation10 + $0x18] sm:$0xff]  ;;  %v734_v45 = vld [vmem:[#allocation10 + $0x28] sm:$0xff] }
  0xef   : > { %1329 = vmatpush1.bf16.msra.mxu0 %v1328_v44  ;;  %1349 = vmatpush3.bf16.msra.mxu1 %v1348_v61  ;;  %v1390_v43 = vpack.c.bf16 %v732_v42, %v731_v41  ;;  %v733_v44 = vld [vmem:[#allocation10 + $0x20] sm:$0xff]  ;;  %v736_v48 = vld [vmem:[#allocation10 + $0x38] sm:$0xff]  ;;  %v738_v51 = vld [vmem:[#allocation10 + $0x48] sm:$0xff] }
  0xf0   : > { %1331 = vmatprep.subr.bf16.mxu0 %v1330_v47  ;;  %1350 = vmatprep.subr.bf16.mxu1 %v1806_v1  ;;  %v1393_v46 = vpack.c.bf16 %v734_v45, %v733_v44  ;;  %v735_v47 = vld [vmem:[#allocation10 + $0x30] sm:$0xff]  ;;  %v737_v50 = vld [vmem:[#allocation10 + $0x40] sm:$0xff]  ;;  %v744_v59 = vld [vmem:[#allocation10 + $0x78] sm:$0xff] }
  0xf1   : > { %v1396_v49 = vpack.c.bf16 %v736_v48, %v735_v47  ;;  %v1399_v52 = vpack.c.bf16 %v738_v51, %v737_v50  ;;  %v741_v55 = vld [vmem:[#allocation10 + $0x60] sm:$0xff]  ;;  %v743_v58 = vld [vmem:[#allocation10 + $0x70] sm:$0xff]  ;;  %v831_v10 = vld [vmem:[#allocation11 + $0x8] sm:$0xff] }
  0xf2   : > { %v1090_v2 = vld [vmem:[%s2251_s4] ss:$0 sm:$0xff]  ;;  %v832_v12 = vld [vmem:[#allocation11 + $0x10] sm:$0xff]  ;;  %v833_v13 = vld [vmem:[#allocation11 + $0x18] sm:$0xff] }
  0xf3   : > { %1333 = vmatpush1.bf16.msra.mxu0 %v1332_v53  ;;  %1352 = vmatpush3.bf16.msra.mxu1 %v1351_v8  ;;  %v740_v53 = vld [vmem:[#allocation10 + $0x58] sm:$0xff]  ;;  %v830_v9 = vld [vmem:[#allocation11] sm:$0xff]  ;;  %v835_v16 = vld [vmem:[#allocation11 + $0x28] sm:$0xff] }
  0xf4   : > { %1335 = vmatprep.subr.bf16.mxu0 %v1334_v56  ;;  %1353 = vmatprep.subr.bf16.mxu1 %v1806_v1  ;;  %v742_v56 = vld [vmem:[#allocation10 + $0x68] sm:$0xff]  ;;  %v837_v19 = vld [vmem:[#allocation11 + $0x38] sm:$0xff] }
  0xf5   : > { %v1405_v57 = vpack.c.bf16 %v742_v56, %v741_v55  ;;  %v839_v22 = vld [vmem:[#allocation11 + $0x48] sm:$0xff]  ;;  %v841_v25 = vld [vmem:[#allocation11 + $0x58] sm:$0xff] }
  0xf6   : > { %v843_v28 = vld [vmem:[#allocation11 + $0x68] sm:$0xff] }
  0xf7   : > { %1337 = vmatpush1.bf16.msra.mxu0 %v1336_v60  ;;  %1355 = vmatpush3.bf16.msra.mxu1 %v1354_v14  ;;  %v1408_v60 = vpack.c.bf16 %v744_v59, %v743_v58  ;;  %v1414_v14 = vpack.c.bf16 %v833_v13, %v832_v12 }
  0xf8   : > { %1362 = vmatprep.subr.bf16.mxu0 %v1806_v1  ;;  %1356 = vmatprep.subr.bf16.mxu1 %v1806_v1 }
  0xfa   : > { %558 = vmatmul.mubr.f32.vlgmr.msra.gmra.mrb[0].mxu0 %v2149_v4 }
  0xfb   : > { %1364 = vmatpush3.bf16.msra.mxu0 %v1363_v5  ;;  %1233 = vmatprep.mubr.msk.f32.mxu0 %vm1807_vm0, %v1805_v0 }
  0xfc   : > { %1365 = vmatprep.subr.bf16.mxu0 %v1806_v1  ;;  %1358 = vmatpush3.bf16.msra.mxu1 %v1357_v34  ;;  %v1091_v34 = vld [vmem:[%s2253_s6] ss:$0 sm:$0xff] }
  0xfd   : > { %1359 = vmatprep.subr.bf16.mxu1 %v1806_v1 }
  0xff   : > { %1367 = vmatpush3.bf16.msra.mxu0 %v1366_v11  ;;  %v1411_v11 = vpack.c.bf16 %v831_v10, %v830_v9 }
 0x100   : > { %1368 = vmatprep.subr.bf16.mxu0 %v1806_v1  ;;  %1361 = vmatpush3.bf16.msra.mxu1 %v1360_v38 }
 0x101   : > { %1386 = vmatprep.subr.bf16.mxu1 %v1806_v1 }
 0x103   : > { %1370 = vmatpush3.bf16.msra.mxu0 %v1369_v15  ;;  %1199 = vmatmul.mubr.f32.vlgmr.msra.gmra.mrb[0].mxu1 %v2149_v4  ;;  %v834_v15 = vld [vmem:[#allocation11 + $0x20] sm:$0xff] }
 0x104   : > { %1371 = vmatprep.subr.bf16.mxu0 %v1806_v1  ;;  %1388 = vmatpush3.bf16.msra.mxu1 %v1387_v40  ;;  %v1417_v17 = vpack.c.bf16 %v835_v16, %v834_v15 }
 0x105   : > { %1268 = vmatprep.mubr.msk.f32.mxu1 %vm1807_vm0, %v1805_v0  ;;  %1389 = vmatprep.subr.bf16.mxu1 %v1806_v1 }
 0x107   : > { %1373 = vmatpush3.bf16.msra.mxu0 %v1372_v18  ;;  %v836_v18 = vld [vmem:[#allocation11 + $0x30] sm:$0xff] }
 0x108   : > { %1374 = vmatprep.subr.bf16.mxu0 %v1806_v1  ;;  %1391 = vmatpush3.bf16.msra.mxu1 %v1390_v43  ;;  %v1420_v20 = vpack.c.bf16 %v837_v19, %v836_v18  ;;  %v1093_v43 = vld [vmem:[%s2255_s8] ss:$0 sm:$0xff] }
 0x109   : > { %1392 = vmatprep.subr.bf16.mxu1 %v1806_v1 }
 0x10b   : > { %1376 = vmatpush3.bf16.msra.mxu0 %v1375_v21  ;;  %v838_v21 = vld [vmem:[#allocation11 + $0x40] sm:$0xff] }
 0x10c   : > { %1377 = vmatprep.subr.bf16.mxu0 %v1806_v1  ;;  %1394 = vmatpush3.bf16.msra.mxu1 %v1393_v46  ;;  %v1423_v23 = vpack.c.bf16 %v839_v22, %v838_v21 }
 0x10d   : > { %1395 = vmatprep.subr.bf16.mxu1 %v1806_v1 }
 0x10f   : > { %1379 = vmatpush3.bf16.msra.mxu0 %v1378_v24  ;;  %v840_v24 = vld [vmem:[#allocation11 + $0x50] sm:$0xff] }
 0x110   : > { %1380 = vmatprep.subr.bf16.mxu0 %v1806_v1  ;;  %1397 = vmatpush3.bf16.msra.mxu1 %v1396_v49  ;;  %v1426_v26 = vpack.c.bf16 %v841_v25, %v840_v24 }
 0x111   : > { %1398 = vmatprep.subr.bf16.mxu1 %v1806_v1 }
 0x113   : > { %1382 = vmatpush3.bf16.msra.mxu0 %v1381_v27  ;;  %v842_v27 = vld [vmem:[#allocation11 + $0x60] sm:$0xff] }
 0x114   : > { %1383 = vmatprep.subr.bf16.mxu0 %v1806_v1  ;;  %1400 = vmatpush3.bf16.msra.mxu1 %v1399_v52  ;;  %v1429_v29 = vpack.c.bf16 %v843_v28, %v842_v27 }
 0x115   : > { %1401 = vmatprep.subr.bf16.mxu1 %v1806_v1 }
 0x117   : > { %1385 = vmatpush3.bf16.msra.mxu0 %v1384_v30  ;;  %v844_v30 = vld [vmem:[#allocation11 + $0x70] sm:$0xff] }
 0x118   : > { %1410 = vmatprep.subr.bf16.mxu0 %v1806_v1 }
 0x11a   : > { %1234 = vmatmul.mubr.f32.vlgmr.msra.gmra.mrb[2].mxu0 %v443_v31  ;;  %v845_v31 = vld [vmem:[#allocation11 + $0x78] sm:$0xff] }
 0x11b   : > { %1303 = vmatprep.mubr.msk.f32.mxu0 %vm1807_vm0, %v1805_v0  ;;  %v739_v0 = vld [vmem:[#allocation10 + $0x50] sm:$0xff]  ;;  %1412 = vmatpush3.bf16.msra.mxu0 %v1411_v11  ;;  %v1432_v32 = vpack.c.bf16 %v845_v31, %v844_v30 }
 0x11c   : > { %v1402_v54 = vpack.c.bf16 %v740_v53, %v739_v0  ;;  %1413 = vmatprep.subr.bf16.mxu0 %v1806_v1 }
 0x11e   : > { %1403 = vmatpush3.bf16.msra.mxu1 %v1402_v54 }
 0x11f   : > { %1404 = vmatprep.subr.bf16.mxu1 %v1806_v1  ;;  %1415 = vmatpush3.bf16.msra.mxu0 %v1414_v14 }
 0x120   : > { %1416 = vmatprep.subr.bf16.mxu0 %v1806_v1 }
 0x122   : > { %1406 = vmatpush3.bf16.msra.mxu1 %v1405_v57 }
 0x123   : > { %1407 = vmatprep.subr.bf16.mxu1 %v1806_v1  ;;  %1418 = vmatpush3.bf16.msra.mxu0 %v1417_v17 }
 0x124   : > { %1419 = vmatprep.subr.bf16.mxu0 %v1806_v1 }
 0x126   : > { %1409 = vmatpush3.bf16.msra.mxu1 %v1408_v60 }
 0x127   : > { %1421 = vmatpush3.bf16.msra.mxu0 %v1420_v20 }
 0x128   : > { %1422 = vmatprep.subr.bf16.mxu0 %v1806_v1 }
 0x12b   : > { %1424 = vmatpush3.bf16.msra.mxu0 %v1423_v23 }
 0x12c   : > { %1425 = vmatprep.subr.bf16.mxu0 %v1806_v1 }
 0x12f   : > { %1427 = vmatpush3.bf16.msra.mxu0 %v1426_v26 }
 0x130   : > { %1428 = vmatprep.subr.bf16.mxu0 %v1806_v1 }
 0x133   : > { %1430 = vmatpush3.bf16.msra.mxu0 %v1429_v29 }
 0x134   : > { %1431 = vmatprep.subr.bf16.mxu0 %v1806_v1 }
 0x137   : > { %1433 = vmatpush3.bf16.msra.mxu0 %v1432_v32 }
 0x1cd   : > { %v559_v61 = vpop.f32.mrb[0].mxu0 }
 0x1ce   : > { %v561_v62 = vpop.f32.mrb[1].mxu0 }
 0x1d6   : > { %v630_v7 = vpop.f32.mrb[0].mxu1 }
 0x1d7   : > { %v1200_v8 = vpop.f32.mrb[1].mxu1 }
 0x1ed   : > { %v716_v63 = vpop.f32.mrb[2].mxu0 }
 0x1ee   : > { %v717_v3 = vadd.f32 %v716_v63, %v559_v61  ;;  %v1235_v4 = vpop.f32.mrb[3].mxu0 }
 0x1f0   : > { %v727_v5 = vadd.f32 %v1090_v2, %v717_v3 }
 0x1f2   : > { %v728_v6 = vmax.f32 %v727_v5, 0.0 }
 0x1f4   : > { %1269 = vmatmul.mubr.f32.vlgmr.msra.gmra.mrb[2].mxu1 %v728_v6 }
 0x2c7   : > { %v811_v33 = vpop.f32.mrb[2].mxu1 }
 0x2c8   : > { %v812_v35 = vadd.f32 %v811_v33, %v561_v62  ;;  %v1270_v36 = vpop.f32.mrb[3].mxu1 }
 0x2ca   : > { %v822_v37 = vadd.f32 %v1091_v34, %v812_v35 }
 0x2cc   : > { %v1092_v38 = vmul.f32 -1.442695, %v822_v37 }
 0x2ce   : > { %1533 = vpow2.f32 %v1092_v38 }
 0x2d8   : > { %v1534_v39 = vpop.eup %1533 }
 0x2d9   : > { %v826_v40 = vadd.f32 1.0, %v1534_v39 }
 0x2db   : > { %1535 = vrcp.f32 %v826_v40 }
 0x2e5   : > { %v1536_v1 = vpop.eup %1535 }
 0x2e6   : > { %v829_v41 = vmul.f32 %v1536_v1, %v822_v37 }
 0x2e8   : > { %1304 = vmatmul.mubr.f32.vlgmr.msra.gmra.mrb[4].mxu0 %v829_v41 }
 0x3bb   : > { %v912_v42 = vpop.f32.mrb[4].mxu0 }
 0x3bc   : > { %v913_v44 = vadd.f32 %v912_v42, %v630_v7  ;;  %v1305_v45 = vpop.f32.mrb[5].mxu0 }
 0x3be   : > { %v923_v46 = vadd.f32 %v1093_v43, %v913_v44 }
 0x3c0   : > { %1537 = vtanh.f32 %v923_v46 }
 0x3ca   : > { %v1538_v47 = vpop.eup %1537 }
 0x3cb   : > { %925 = vst [vmem:[%s442_s3] sm:$0xff] %v1538_v47 }
 0x3cc   : > { %1724 = shalt.err (!%p1721_p6)
}
 0x3cd   : > { %s1725_s21 = scalar_lea.hbm %s2203_s2, 128  ;;  %s1729_s26 = scalar_lea.hbm %s2289_s20, 256 }
 0x3ce   : > { %p1726_p4 = scmp.ne.s32.totalorder %s2203_s2, %s1725_s21  ;;  %p1730_p10 = scmp.lt.u32.totalorder %s2203_s2, %s2289_s20 }
 0x3cf   : > { %p1731_p1 = scmp.lt.u32.totalorder %s1729_s26, %s1725_s21  ;;  %p1733_p12 = scmp.lt.u32.totalorder %s1725_s21, %s2203_s2 }
 0x3d0   : > { %p1727_p8 = pnand %p1726_p4, %p2290_p13 }
 0x3d1   : > { %p1732_p11 = por %p1731_p1, %p1730_p10 }
 0x3d2   : > { %p1728_p5 = pneg %p1727_p8 }
 0x3d3   : > { %p1734_p7 = por %p1733_p12, %p1732_p11 }
 0x3d5   : > { %p1735_p9 = pnand %p1734_p7, %p1728_p5 }
 0x3d7   : > { %1738 = shalt.err (!%p1735_p9)
}
 0x3d8   : > { %1454 = dma.vmem_to_hbm [thread:$0]  (%p2290_p13), %s2205_s29, 128, %s2203_s2, %s927_s16  }
 0x3d9 PF: > { %s952_s24 = sand.u32 1, %s1781_s30   ;;  %p2291_p0 = scmp.ne.s32.totalorder %s2279_s28, 0 }
 0x3da   : > { %p2292_p2 = scmp.ge.s32.totalorder %s1793_s12, 2  ;;  %s953_s25 = scalar_lea.sflag [#allocation4], %s952_s24 }
 0x3dc   : > { %p1477_p3 = pnand %p2292_p2, %p2291_p0 }
 0x3de   : > { %1776 = dma.done.wait (!%p1477_p3), %s953_s25, 128  }
 0x3df   : > { %1778 = vsyncadd (!%p1477_p3), %s953_s25, 4294967168  ;;  %s2293_s3 = sld [smem:[#allocation20_spill]]  ;;  %p27_p6 = scmp.ge.s32.totalorder %s2004_s27, 4  }
 0x3e0   : > { %s2294_s30 = smov %s1785_s10  ;;  %s2295_s10 = smov %s1789_s11 }
 0x3e1   : > { %s2297_s12 = smov %s2004_s27  ;;  %29 = sbr.rel (!%p27_p6) target bundleno = 15 (0xf), region = 130 }
 0x3e5   : > { %s2296_s11 = smov %s2293_s3 }
 0x3e8   :  { %958 = vsyncpa [#allocation3], 1 }
 0x3e9   :  { %960 = vsyncpa [#allocation3 + $0x1], 1 }
 0x3ea   :  { %961 = vsyncpa [#allocation6], 1 }
 0x3eb   :  { %963 = vsyncpa [#allocation6 + $0x1], 1 }
 0x3ec   :  { %964 = vsyncpa [#allocation9], 1 }
 0x3ed   :  { %965 = vsyncpa [#allocation12], 1 }
 0x3ee   :  { %966 = vsyncpa [#allocation4], 1 }
 0x3ef   :  { %968 = vsyncpa [#allocation4 + $0x1], 1 }

</bundles_post_ra>
